<compile_context>
chip_gen: v5e
topology: v5e:2x2
jax: 0.10.0
libtpu: 0.0.40
codegen_flags: <defaults>
</compile_context>

<pallas_src>
import functools

import jax
import jax.numpy as jnp
from jax.experimental import pallas as pl
from jax.experimental.pallas import tpu as pltpu


def _se_kernel(x_ref, w1_ref, w2_ref, o_ref, *, inv_hw, f32_scale):
    # x_ref / o_ref block: (Bt, C, HWp); w1: (hidden, C); w2: (C, hidden).
    x = x_ref[...]                                     # (Bt, C, HWp), io dtype
    xf = x.astype(jnp.float32)

    # --- squeeze: global average pool over spatial dims (f32 accumulate).
    # Padded lanes are zero, so dividing by the true HW gives the exact mean.
    pooled = jnp.sum(xf, axis=-1) * inv_hw             # (Bt, C)

    # --- excitation: fc1 -> relu -> fc2 -> sigmoid (all f32, batched).
    w1 = w1_ref[...].astype(jnp.float32)               # (hidden, C)
    w2 = w2_ref[...].astype(jnp.float32)               # (C, hidden)
    h = jax.lax.dot_general(pooled, w1, (((1,), (1,)), ((), ())),
                            preferred_element_type=jnp.float32)   # (Bt, hidden)
    h = jnp.maximum(h, 0.0)
    y = jax.lax.dot_general(h, w2, (((1,), (1,)), ((), ())),
                            preferred_element_type=jnp.float32)   # (Bt, C)
    y = jax.nn.sigmoid(y)

    # --- scale: one fused pass, broadcast (Bt, C, 1) over the HW lanes.
    if f32_scale:
        # v5e bf16 path: no bf16 VALU -> reuse the f32 copy, cast at store.
        o_ref[...] = (xf * y[:, :, None]).astype(o_ref.dtype)
    else:
        o_ref[...] = x * y[:, :, None].astype(x.dtype)


def _hw_params():
    """Per-generation knobs: (is_v5e, num_tensorcores, block_cap, vmem_ceiling)."""
    kind = ""
    try:
        kind = jax.devices()[0].device_kind.lower()
    except Exception:
        pass
    is_v7 = "v7" in kind
    is_v5e = ("v5 lite" in kind) or ("v5e" in kind) or ("v5litepod" in kind)
    num_tc = 2 if is_v7 else 1
    if is_v5e:
        block_cap = 3 * 1024 * 1024        # scoped default is only 16 MiB
        vmem_ceiling = 96 * 1024 * 1024    # physical 128 MiB
    elif is_v7:
        block_cap = 6 * 1024 * 1024
        vmem_ceiling = 48 * 1024 * 1024    # physical 64 MiB per TC -> headroom
    else:                                   # v6e / default
        block_cap = 6 * 1024 * 1024
        vmem_ceiling = 96 * 1024 * 1024    # physical 128 MiB
    return is_v5e, num_tc, block_cap, vmem_ceiling


def _pick_batch_tile(B, per_batch_bytes, *, block_cap_bytes, num_tc,
                     target_bytes=2 * 1024 * 1024):
    """Pick Bt (a divisor of B): grow blocks toward ~2 MiB/step to amortize the
    ~0.35 us per-step overhead, capped per generation.  On multi-TC chips keep
    an even number of grid steps (>= num_tc) so the 'parallel' batch axis
    splits across TensorCores without a 2:1 imbalance; single-TC chips may
    collapse to one grid step."""
    best = 1
    for bt in range(1, B + 1):
        if B % bt:
            continue
        steps = B // bt
        if num_tc > 1 and B > 1 and (steps < num_tc or steps % num_tc):
            continue
        if bt * per_batch_bytes > block_cap_bytes:
            break
        best = bt
        if bt * per_batch_bytes >= target_bytes:
            break
    return best


def se_block(x, w1, w2):
    """SEBlock forward.

    x:  (B, C, H, W)  f32 or bf16 (bf16 halves HBM traffic; internals are f32)
    w1: (C//r, C)     torch nn.Linear(channel, channel//r, bias=False).weight
    w2: (C, C//r)     torch nn.Linear(channel//r, channel, bias=False).weight
    """
    B, C, H, W = x.shape
    hidden = w1.shape[0]
    HW = H * W
    HWp = ((HW + 127) // 128) * 128          # lane-dense (unmasked) stores

    x_flat = x.reshape(B, C, HW)
    if HWp != HW:
        x_flat = jnp.pad(x_flat, ((0, 0), (0, 0), (0, HWp - HW)))

    is_v5e, num_tc, block_cap, vmem_ceiling = _hw_params()

    itemsize = x.dtype.itemsize
    per_batch_bytes = C * HWp * itemsize
    bt = _pick_batch_tile(B, per_batch_bytes, block_cap_bytes=block_cap,
                          num_tc=num_tc)
    grid = (B // bt,)

    # Explicit VMEM budget: 2 streams x 2 pipeline buffers per block, plus an
    # f32 working copy of the block (pooling / v5e scale path), weights, slack.
    block_bytes = bt * per_batch_bytes
    block_f32_bytes = bt * C * HWp * 4
    weight_bytes = (w1.size + w2.size) * 4
    vmem_needed = 4 * block_bytes + 2 * block_f32_bytes + weight_bytes \
        + 2 * 1024 * 1024
    # TODO(synk): for very large C*HW that does not fit even at bt=1 (e.g.
    # C=512, 56x56 on v7x), split into a pooled/y pass (HW-tiled, 'arbitrary'
    # reduction axis) followed by an HW-tiled scale pass instead of asserting.
    assert vmem_needed <= vmem_ceiling, (
        f"SE block of {block_bytes} bytes needs ~{vmem_needed} bytes of VMEM, "
        f"exceeding the {vmem_ceiling}-byte ceiling for this TPU generation")
    vmem_limit = min(vmem_ceiling, max(vmem_needed, 16 * 1024 * 1024))

    f32_scale = bool(is_v5e) and x.dtype == jnp.bfloat16
    kernel = functools.partial(_se_kernel, inv_hw=float(1.0 / HW),
                               f32_scale=f32_scale)

    out_flat = pl.pallas_call(
        kernel,
        out_shape=jax.ShapeDtypeStruct((B, C, HWp), x.dtype),
        grid_spec=pltpu.PrefetchScalarGridSpec(
            num_scalar_prefetch=0,
            grid=grid,
            in_specs=[
                pl.BlockSpec((bt, C, HWp), lambda i: (i, 0, 0)),
                pl.BlockSpec((hidden, C), lambda i: (0, 0)),   # w1, untransposed
                pl.BlockSpec((C, hidden), lambda i: (0, 0)),   # w2, untransposed
            ],
            out_specs=pl.BlockSpec((bt, C, HWp), lambda i: (i, 0, 0)),
        ),
        compiler_params=pltpu.CompilerParams(
            dimension_semantics=("parallel",),
            vmem_limit_bytes=int(vmem_limit)),
    )(x_flat, w1, w2)

    if HWp != HW:
        out_flat = out_flat[..., :HW]
    return out_flat.reshape(B, C, H, W)


def _reference(x, w1, w2):
    # Pure-JAX reference mirroring the PyTorch forward (f32 math).
    pooled = jnp.mean(x, axis=(2, 3))                     # (B, C)
    h = jnp.maximum(pooled @ w1.T, 0.0)                   # (B, C//r)
    y = jax.nn.sigmoid(h @ w2.T)                          # (B, C)
    return x * y[:, :, None, None]


if __name__ == "__main__":
    # Module config: channel=64, reduction=16 -> hidden=4
    B, C, H, W = 2, 64, 16, 16
    reduction = 16
    hidden = C // reduction

    key = jax.random.PRNGKey(0)
    kx, k1, k2 = jax.random.split(key, 3)
    x = jax.random.normal(kx, (B, C, H, W), dtype=jnp.float32)
    w1 = jax.random.normal(k1, (hidden, C), dtype=jnp.float32) * 0.1
    w2 = jax.random.normal(k2, (C, hidden), dtype=jnp.float32) * 0.1

    # --- f32 I/O path: must match the pure-JAX reference tightly ---
    out = jax.block_until_ready(se_block(x, w1, w2))
    ref = _reference(x, w1, w2)
    assert out.shape == (B, C, H, W)
    assert out.dtype == jnp.float32
    assert jnp.allclose(out, ref, atol=1e-5, rtol=1e-5), "f32 mismatch vs reference"

    # --- non-128-multiple spatial size (pads HW internally, e.g. 14x14=196) ---
    x_small = jax.random.normal(kx, (B, C, 14, 14), dtype=jnp.float32)
    out_small = jax.block_until_ready(se_block(x_small, w1, w2))
    ref_small = _reference(x_small, w1, w2)
    assert jnp.allclose(out_small, ref_small, atol=1e-5, rtol=1e-5), \
        "padded-HW mismatch vs reference"

    # --- bf16 I/O path (halved HBM traffic), internals stay f32 ---
    x_bf16 = x.astype(jnp.bfloat16)
    out_bf16 = jax.block_until_ready(se_block(x_bf16, w1, w2))
    ref_bf16 = _reference(x_bf16.astype(jnp.float32), w1, w2)
    assert out_bf16.dtype == jnp.bfloat16
    assert jnp.allclose(out_bf16.astype(jnp.float32), ref_bf16,
                        atol=5e-2, rtol=5e-2), "bf16 mismatch vs reference"

    print("KERNEL_OK")
</pallas_src>

<mosaic_0001>
module attributes {stable_mosaic.version = 11 : i64} {
  func.func @_se_kernel(%arg0: i32, %arg1: memref<2x64x256xf32, #tpu.memory_space<vmem>>, %arg2: memref<4x64xf32, #tpu.memory_space<vmem>>, %arg3: memref<64x4xf32, #tpu.memory_space<vmem>>, %arg4: memref<2x64x256xf32, #tpu.memory_space<vmem>>) attributes {dimension_semantics = [#tpu.dimension_semantics<parallel>], iteration_bounds = array<i64: 1>, scalar_prefetch = 0 : i64, scratch_operands = 0 : i64, tpu.core_type = #tpu.core_type<tc>, window_params = [{transform_indices = @transform_0, window_bounds = array<i64: 2, 64, 256>}, {pipeline_mode = #tpu.pipeline_mode<synchronous>, transform_indices = @transform_1, window_bounds = array<i64: 4, 64>}, {pipeline_mode = #tpu.pipeline_mode<synchronous>, transform_indices = @transform_2, window_bounds = array<i64: 64, 4>}, {transform_indices = @transform_3, window_bounds = array<i64: 2, 64, 256>}]} {
    %c0 = arith.constant 0 : index
    %c0_0 = arith.constant 0 : index
    %c0_1 = arith.constant 0 : index
    %0 = vector.load %arg1[%c0, %c0_0, %c0_1] : memref<2x64x256xf32, #tpu.memory_space<vmem>>, vector<2x64x256xf32>
    %cst = arith.constant dense<0.000000e+00> : vector<2x64xf32>
    %1 = vector.multi_reduction <add>, %0, %cst [2] : vector<2x64x256xf32> to vector<2x64xf32>
    %cst_2 = arith.constant 3.906250e-03 : f32
    %2 = vector.broadcast %cst_2 : f32 to vector<2x64xf32>
    %3 = arith.mulf %1, %2 : vector<2x64xf32>
    %c0_3 = arith.constant 0 : index
    %c0_4 = arith.constant 0 : index
    %4 = vector.load %arg2[%c0_3, %c0_4] : memref<4x64xf32, #tpu.memory_space<vmem>>, vector<4x64xf32>
    %c0_5 = arith.constant 0 : index
    %c0_6 = arith.constant 0 : index
    %5 = vector.load %arg3[%c0_5, %c0_6] : memref<64x4xf32, #tpu.memory_space<vmem>>, vector<64x4xf32>
    %cst_7 = arith.constant dense<0.000000e+00> : vector<2x4xf32>
    %6 = tpu.matmul %3, %4, %cst_7 {dimension_numbers = #tpu.dot_dimension_numbers<[1], [1], [0], [0], [0, 0, 1, 0], [], []>} : vector<2x64xf32>, vector<4x64xf32>, vector<2x4xf32> -> vector<2x4xf32>
    %cst_8 = arith.constant 0.000000e+00 : f32
    %7 = vector.broadcast %cst_8 : f32 to vector<2x4xf32>
    %8 = arith.maximumf %6, %7 : vector<2x4xf32>
    %cst_9 = arith.constant dense<0.000000e+00> : vector<2x64xf32>
    %9 = tpu.matmul %8, %5, %cst_9 {dimension_numbers = #tpu.dot_dimension_numbers<[1], [1], [0], [0], [0, 0, 1, 0], [], []>} : vector<2x4xf32>, vector<64x4xf32>, vector<2x64xf32> -> vector<2x64xf32>
    %10 = arith.negf %9 : vector<2x64xf32>
    %11 = math.exp %10 : vector<2x64xf32>
    %cst_10 = arith.constant 1.000000e+00 : f32
    %12 = vector.broadcast %cst_10 : f32 to vector<2x64xf32>
    %13 = arith.addf %12, %11 : vector<2x64xf32>
    %14 = arith.divf %12, %13 : vector<2x64xf32>
    %15 = vector.shape_cast %14 : vector<2x64xf32> to vector<2x64x1xf32>
    %16 = vector.broadcast %15 : vector<2x64x1xf32> to vector<2x64x256xf32>
    %17 = arith.mulf %0, %16 : vector<2x64x256xf32>
    %c0_11 = arith.constant 0 : index
    %c0_12 = arith.constant 0 : index
    %c0_13 = arith.constant 0 : index
    %18 = vector.load %arg4[%c0_11, %c0_12, %c0_13] : memref<2x64x256xf32, #tpu.memory_space<vmem>>, vector<2x64x256xf32>
    tpu.vector_store %arg4[%c0_11, %c0_12, %c0_13], %17 {strides = array<i32>} : memref<2x64x256xf32, #tpu.memory_space<vmem>>, vector<2x64x256xf32>,
    return
  }
  func.func @transform_0(%arg0: i32) -> (i32, i32, i32) {
    %c0_i32 = arith.constant 0 : i32
    %c0_i32_0 = arith.constant 0 : i32
    %c0_i32_1 = arith.constant 0 : i32
    return %arg0, %c0_i32, %c0_i32_0 : i32, i32, i32
  }
  func.func @transform_1(%arg0: i32) -> (i32, i32) {
    %c0_i32 = arith.constant 0 : i32
    %c0_i32_0 = arith.constant 0 : i32
    %c0_i32_1 = arith.constant 0 : i32
    return %c0_i32, %c0_i32_0 : i32, i32
  }
  func.func @transform_2(%arg0: i32) -> (i32, i32) {
    %c0_i32 = arith.constant 0 : i32
    %c0_i32_0 = arith.constant 0 : i32
    %c0_i32_1 = arith.constant 0 : i32
    return %c0_i32, %c0_i32_0 : i32, i32
  }
  func.func @transform_3(%arg0: i32) -> (i32, i32, i32) {
    %c0_i32 = arith.constant 0 : i32
    %c0_i32_0 = arith.constant 0 : i32
    %c0_i32_1 = arith.constant 0 : i32
    return %arg0, %c0_i32, %c0_i32_0 : i32, i32, i32
  }
}

</mosaic_0001>

<bundles_post_ra>
// kernel: tpu_custom_call.1
= control target key start
LH: loop header
LB: loop body
LE: loop exit
PB: predicated region body
PF: predicated region fallthrough
CT: control target
= control target key end

     0   :  { %8 = vsyncpa [#allocation3], 0  ;;  %s776_s0 = inlined_call_operand.hbm [shape: f32[2,64,256], index: 0, kind: input, shape index: {}]   ;;  %s777_s1 = inlined_call_operand.vmem [shape: f32[4,64], index: 1, kind: input, shape index: {}]   ;;  %s778_s2 = inlined_call_operand.vmem [shape: f32[64,4], index: 2, kind: input, shape index: {}]   ;;  %s779_s3 = inlined_call_operand.hbm [shape: f32[2,64,256], index: 3, kind: output, shape index: {}]  }
   0x1   :  { %9 = vsyncpa [#allocation4], 0  ;;  %s14_s14 = sshll.u32 %s776_s0, 4  ;;  %s564_s15 = smov [#allocation2]   ;;  %s15_s14 = int_to_ptr.hbm [resolvable:$true] %s14_s14 }
   0x2   :  { %s16_s16 = sshll.u32 %s564_s15, 4  ;;  %s565_s17 = smov 256   ;;  %s17_s16 = int_to_ptr.vmem [resolvable:$true] %s16_s16 }
   0x3   :  { %s566_s18 = smov 16  }
   0x4   :  { %22 = dma.hbm_to_vmem [thread:$0]  %s15_s14, 4096, %s17_s16, [#allocation3], %s565_s17, %s565_s17, %s566_s18  }
   0x5   :  { %560 = dma.done.wait [#allocation3], 4096  }
   0x6   :  { %561 = vsyncadd [#allocation3], 4294963200  ;;  %v594_v0 = vld [vmem:[#allocation2 + $0x80] sm:$0xff]  ;;  %v596_v1 = vld [vmem:[#allocation2 + $0x88] sm:$0xff]  ;;  %vm200_vm0 = vcmask 523264   ;;  %vm227_vm1 = vcmask 31744   ;;  %v780_v60 = vlaneseq }
   0x7   :  { %v598_v2 = vld [vmem:[#allocation2] sm:$0xff]  ;;  %v87_v3 = vadd.f32 %v596_v1, %v594_v0  ;;  %v602_v4 = vld [vmem:[#allocation2 + $0x8] sm:$0xff]  ;;  %v612_v9 = vld [vmem:[#allocation2 + $0x90] sm:$0xff]  ;;  %vm157_vm2 = vcmask 130112   ;;  %vm161_vm3 = vcmask 195712   ;;  %vm165_vm4 = vcmask 261312  }
   0x8   :  { %v604_v5 = vld [vmem:[#allocation2 + $0x20] sm:$0xff]  ;;  %v606_v6 = vld [vmem:[#allocation2 + $0x28] sm:$0xff]  ;;  %v63_v7 = vadd.f32 %v602_v4, %v598_v2  ;;  %v614_v10 = vld [vmem:[#allocation2 + $0x98] sm:$0xff]  ;;  %v153_v62 = vand.u32 127, %v780_v60  ;;  %vm169_vm5 = vcmask 326912   ;;  %vm173_vm6 = vcmask 392512  }
   0x9   :  { %v69_v8 = vadd.f32 %v606_v6, %v604_v5  ;;  %88 = vadd.xlane.f32.xlu1 %v87_v3  ;;  %v616_v11 = vld [vmem:[#allocation2 + $0x10] sm:$0xff]  ;;  %v618_v12 = vld [vmem:[#allocation2 + $0x18] sm:$0xff]  ;;  %v620_v13 = vld [vmem:[#allocation2 + $0xa0] sm:$0xff]  ;;  %v90_v15 = vadd.f32 %v614_v10, %v612_v9  ;;  %vm177_vm7 = vcmask 458112   ;;  %vm181_vm8 = vcmask 523712   ;;  %s462_s11 = sshll.u32 %s779_s3, 4  ;;  %s463_s11 = int_to_ptr.hbm [resolvable:$true] %s462_s11 }
   0xa   :  { %64 = vadd.xlane.f32.xlu0 %v63_v7  ;;  %v622_v14 = vld [vmem:[#allocation2 + $0xa8] sm:$0xff]  ;;  %v66_v16 = vadd.f32 %v618_v12, %v616_v11  ;;  %v630_v18 = vld [vmem:[#allocation2 + $0xb0] sm:$0xff]  ;;  %v632_v19 = vld [vmem:[#allocation2 + $0xb8] sm:$0xff]  ;;  %vm198_vm9 = vcmask 1041409  }
   0xb   :  { %70 = vadd.xlane.f32.xlu2 %v69_v8  ;;  %v93_v17 = vadd.f32 %v622_v14, %v620_v13  ;;  %v634_v20 = vld [vmem:[#allocation2 + $0x30] sm:$0xff]  ;;  %v636_v21 = vld [vmem:[#allocation2 + $0x38] sm:$0xff]  ;;  %v638_v22 = vld [vmem:[#allocation2 + $0x40] sm:$0xff]  ;;  %v96_v24 = vadd.f32 %v632_v19, %v630_v18  ;;  %v155_v8 = vadd.s32 4294967288, %v153_v62 }
   0xc   :  { %v640_v23 = vld [vmem:[#allocation2 + $0x48] sm:$0xff]  ;;  %v72_v25 = vadd.f32 %v636_v21, %v634_v20  ;;  %v648_v27 = vld [vmem:[#allocation2 + $0x50] sm:$0xff]  ;;  %v650_v28 = vld [vmem:[#allocation2 + $0x58] sm:$0xff] }
   0xd   :  { %v75_v26 = vadd.f32 %v640_v23, %v638_v22  ;;  %v652_v29 = vld [vmem:[#allocation2 + $0xc0] sm:$0xff]  ;;  %v654_v30 = vld [vmem:[#allocation2 + $0xc8] sm:$0xff]  ;;  %v656_v31 = vld [vmem:[#allocation2 + $0xd0] sm:$0xff]  ;;  %v78_v33 = vadd.f32 %v650_v28, %v648_v27 }
   0xe   :  { %v658_v32 = vld [vmem:[#allocation2 + $0xd8] sm:$0xff]  ;;  %v99_v34 = vadd.f32 %v654_v30, %v652_v29  ;;  %v666_v36 = vld [vmem:[#allocation2 + $0xe0] sm:$0xff]  ;;  %v668_v37 = vld [vmem:[#allocation2 + $0xe8] sm:$0xff] }
   0xf   :  { %v102_v35 = vadd.f32 %v658_v32, %v656_v31  ;;  %v670_v38 = vld [vmem:[#allocation2 + $0x60] sm:$0xff]  ;;  %v672_v39 = vld [vmem:[#allocation2 + $0x68] sm:$0xff]  ;;  %v674_v40 = vld [vmem:[#allocation2 + $0x70] sm:$0xff]  ;;  %v105_v42 = vadd.f32 %v668_v37, %v666_v36 }
  0x10   :  { %v676_v41 = vld [vmem:[#allocation2 + $0x78] sm:$0xff]  ;;  %v81_v43 = vadd.f32 %v672_v39, %v670_v38  ;;  %v684_v45 = vld [vmem:[#allocation2 + $0xf0] sm:$0xff]  ;;  %v127_v54 = vld [vmem:[%s777_s1] sm:$0xf] }
  0x11   :  { %91 = vadd.xlane.f32.xlu1 %v90_v15  ;;  %v84_v44 = vadd.f32 %v676_v41, %v674_v40  ;;  %v686_v46 = vld [vmem:[#allocation2 + $0xf8] sm:$0xff]  ;;  %475 = vmatpush.xpose.msk.msra.mxu0 %vm200_vm0, %v127_v54  ;;  %v134_v59 = vld [vmem:[%s778_s2 + $0x30] sm:$0xff]  ;;  %v133_v61 = vld [vmem:[%s778_s2 + $0x28] sm:$0xff] }
  0x12   :  { %67 = vadd.xlane.f32.xlu0 %v66_v16  ;;  %v108_v47 = vadd.f32 %v686_v46, %v684_v45  ;;  %v135_v56 = vld [vmem:[%s778_s2 + $0x38] sm:$0xff]  ;;  %v132_v16 = vld [vmem:[%s778_s2 + $0x20] sm:$0xff] }
  0x13   :  { %94 = vadd.xlane.f32.xlu2 %v93_v17  ;;  %477 = vmatpush.xpose.msk.msra.mxu1 %vm227_vm1, %v135_v56 }
  0x17   :  { %478 = vmatpush.xpose.msk.msra.mxu1 %vm227_vm1, %v134_v59 }
  0x19   :  { %97 = vadd.xlane.f32.xlu1 %v96_v24 }
  0x1a   :  { %73 = vadd.xlane.f32.xlu0 %v72_v25 }
  0x1b   :  { %76 = vadd.xlane.f32.xlu2 %v75_v26  ;;  %479 = vmatpush.xpose.msk.msra.mxu1 %vm227_vm1, %v133_v61  ;;  %v159_v26 = vadd.s32 4294967280, %v153_v62 }
  0x1f   :  { %480 = vmatpush.xpose.msk.msra.mxu1 %vm227_vm1, %v132_v16 }
  0x21   :  { %79 = vadd.xlane.f32.xlu1 %v78_v33 }
  0x22   :  { %100 = vadd.xlane.f32.xlu0 %v99_v34 }
  0x23   :  { %103 = vadd.xlane.f32.xlu2 %v102_v35  ;;  %v163_v35 = vadd.s32 4294967272, %v153_v62 }
  0x29   :  { %106 = vadd.xlane.f32.xlu1 %v105_v42 }
  0x2a   :  { %82 = vadd.xlane.f32.xlu0 %v81_v43  ;;  %v131_v43 = vld [vmem:[%s778_s2 + $0x18] sm:$0xff] }
  0x2b   :  { %85 = vadd.xlane.f32.xlu2 %v84_v44  ;;  %481 = vmatpush.xpose.msk.msra.mxu1 %vm227_vm1, %v131_v43 }
  0x32   :  { %109 = vadd.xlane.f32.xlu0 %v108_v47 }
  0x7c   :  { %v89_v48 = vpop.xlane.xlu1 %88 }
  0x7d   :  { %v65_v49 = vpop.xlane.xlu0 %64  ;;  %v119_v17 = vmul.f32 0.00390625, %v89_v48 }
  0x7e   :  { %v71_v50 = vpop.xlane.xlu2 %70  ;;  %v111_v24 = vmul.f32 0.00390625, %v65_v49 }
  0x7f   :  { %v113_v33 = vmul.f32 0.00390625, %v71_v50  ;;  %v183_v47 = vperm.slane %v119_v17, %v153_v62 }
  0x81   :  { %v160_v49 = vperm.slane %v113_v33, %v159_v26 }
  0x84   :  { %v92_v51 = vpop.xlane.xlu1 %91 }
  0x85   :  { %v68_v52 = vpop.xlane.xlu0 %67  ;;  %v120_v25 = vmul.f32 0.00390625, %v92_v51  ;;  %v167_v51 = vadd.s32 4294967264, %v153_v62 }
  0x86   :  { %v95_v53 = vpop.xlane.xlu2 %94  ;;  %v112_v15 = vmul.f32 0.00390625, %v68_v52  ;;  %v154_v52 = vperm.slane %v111_v24, %v153_v62 }
  0x87   :  { %v121_v44 = vmul.f32 0.00390625, %v95_v53  ;;  %v184_v54 = vperm.slane %v120_v25, %v155_v8  ;;  %v130_v53 = vld [vmem:[%s778_s2 + $0x10] sm:$0xff] }
  0x88   :  { %v156_v34 = vperm.slane %v112_v15, %v155_v8  ;;  %v171_v15 = vadd.s32 4294967256, %v153_v62  ;;  %482 = vmatpush.xpose.msk.msra.mxu1 %vm227_vm1, %v130_v53 }
  0x89   :  { %v186_v17 = vperm.slane %v121_v44, %v159_v26  ;;  %v179_v26 = vadd.s32 4294967240, %v153_v62 }
  0x8c   :  { %v98_v55 = vpop.xlane.xlu1 %97 }
  0x8d   :  { %v74_v57 = vpop.xlane.xlu0 %73  ;;  %v122_v48 = vmul.f32 0.00390625, %v98_v55  ;;  %v175_v55 = vadd.s32 4294967248, %v153_v62 }
  0x8e   :  { %v77_v58 = vpop.xlane.xlu2 %76  ;;  %v114_v42 = vmul.f32 0.00390625, %v74_v57  ;;  %v158_v57 = vsel %vm157_vm2, %v156_v34, %v154_v52 }
  0x8f   :  { %v115_v56 = vmul.f32 0.00390625, %v77_v58  ;;  %v185_v58 = vsel %vm157_vm2, %v184_v54, %v183_v47  ;;  %v162_v33 = vsel %vm161_vm3, %v160_v49, %v158_v57 }
  0x90   :  { %v164_v61 = vperm.slane %v114_v42, %v163_v35 }
  0x91   :  { %v168_v34 = vperm.slane %v115_v56, %v167_v51 }
  0x92   :  { %v166_v43 = vsel %vm165_vm4, %v164_v61, %v162_v33 }
  0x94   :  { %v80_v63 = vpop.xlane.xlu1 %79 }
  0x95   :  { %v101_v3 = vpop.xlane.xlu0 %100  ;;  %v116_v16 = vmul.f32 0.00390625, %v80_v63 }
  0x96   :  { %v104_v7 = vpop.xlane.xlu2 %103  ;;  %v123_v50 = vmul.f32 0.00390625, %v101_v3  ;;  %v188_v3 = vperm.slane %v122_v48, %v163_v35  ;;  %v187_v35 = vsel %vm161_vm3, %v186_v17, %v185_v58 }
  0x97   :  { %v124_v25 = vmul.f32 0.00390625, %v104_v7  ;;  %v172_v52 = vperm.slane %v116_v16, %v171_v15 }
  0x98   :  { %v190_v42 = vperm.slane %v123_v50, %v167_v51  ;;  %v189_v47 = vsel %vm165_vm4, %v188_v3, %v187_v35  ;;  %v781_v3 = vlaneseq }
  0x99   :  { %v192_v54 = vperm.slane %v124_v25, %v171_v15 }
  0x9a   :  { %v191_v48 = vsel %vm169_vm5, %v190_v42, %v189_v47  ;;  %v296_v25 = vshrl.u32 %v781_v3, 7 }
  0x9b   :  { %v193_v61 = vsel %vm173_vm6, %v192_v54, %v191_v48 }
  0x9c   :  { %v107_v60 = vpop.xlane.xlu1 %106  ;;  %491 = vset.pattern.permute.xlu1 %v296_v25  ;;  %v309_v33 = vadd.s32 16, %v296_v25 }
  0x9d   :  { %v83_v59 = vpop.xlane.xlu0 %82  ;;  %v125_v63 = vmul.f32 0.00390625, %v107_v60  ;;  %v170_v60 = vsel %vm169_vm5, %v168_v34, %v166_v43  ;;  %v303_v34 = vadd.s32 8, %v296_v25 }
  0x9e   :  { %v117_v8 = vmul.f32 0.00390625, %v83_v59  ;;  %v86_v24 = vpop.xlane.xlu2 %85  ;;  %v129_v59 = vld [vmem:[%s778_s2 + $0x8] sm:$0xff]  ;;  %v174_v62 = vsel %vm173_vm6, %v172_v52, %v170_v60  ;;  %493 = vset.pattern.permute.xlu0 %v309_v33 }
  0x9f   :  { %v118_v44 = vmul.f32 0.00390625, %v86_v24  ;;  %v194_v49 = vperm.slane %v125_v63, %v175_v55  ;;  %483 = vmatpush.xpose.msk.msra.mxu1 %vm227_vm1, %v129_v59  ;;  %492 = vset.pattern.permute.xlu2 %v303_v34 }
  0xa0   :  { %v176_v7 = vperm.slane %v117_v8, %v175_v55  ;;  %v128_v55 = vld [vmem:[%s778_s2] sm:$0xff]  ;;  %s567_s2 = smov [#allocation5]  }
  0xa1   :  { %v180_v56 = vperm.slane %v118_v44, %v179_v26  ;;  %v195_v53 = vsel %vm177_vm7, %v194_v49, %v193_v61  ;;  %v327_v61 = vadd.s32 40, %v296_v25  ;;  %s460_s8 = sshll.u32 %s567_s2, 4  ;;  %s461_s8 = int_to_ptr.vmem [resolvable:$true] %s460_s8 }
  0xa2   :  { %v178_v57 = vsel %vm177_vm7, %v176_v7, %v174_v62  ;;  %v315_v62 = vadd.s32 24, %v296_v25 }
  0xa3   :  { %v182_v17 = vsel %vm181_vm8, %v180_v56, %v178_v57  ;;  %484 = vmatpush.xpose.msk.msra.mxu1 %vm227_vm1, %v128_v55  ;;  %v321_v56 = vadd.s32 32, %v296_v25  ;;  %v333_v57 = vadd.s32 48, %v296_v25 }
  0xa5   :  { %v110_v51 = vpop.xlane.xlu0 %109 }
  0xa6   :  { %v126_v50 = vmul.f32 0.00390625, %v110_v51 }
  0xa8   :  { %v196_v16 = vperm.slane %v126_v50, %v179_v26 }
  0xaa   :  { %v197_v15 = vsel %vm181_vm8, %v196_v16, %v195_v53  ;;  %v339_v16 = vadd.s32 56, %v296_v25 }
  0xab   :  { %v199_v8 = vsel %vm198_vm9, %v197_v15, %v182_v17 }
  0xac   :  { %476 = vmatmul.msk.f32.vlgmr.msra.gmra.mxu0 %vm200_vm0, %v199_v8 }
 0x129   :  { %v223_v24 = vpop.f32.mrf.mxu0 }
 0x12a   :  { %v226_v58 = vmax.f32 %v223_v24, 0.0 }
 0x12c   :  { %485 = vmatmul.msk.f32.vlgmr.msra.gmra.mxu1 %vm227_vm1, %v226_v58 }
 0x1a9   :  { %v272_v42 = vpop.f32.mrf.mxu1 }
 0x1aa   :  { %v486_v63 = vmul.f32 -1.442695, %v272_v42 }
 0x1ac   :  { %508 = vpow2.f32 %v486_v63 }
 0x1b2   :  { %v509_v43 = vpop.eup %508 }
 0x1b3   :  { %v278_v52 = vadd.f32 1.0, %v509_v43 }
 0x1b5   :  { %510 = vrcp.f32 %v278_v52  ;;  %v290_v35 = vand.u32 2147483648, %v278_v52  ;;  %v288_v47 = vand.u32 2147483647, %v278_v52  ;;  %vm284_vm11 = vweird.f32 %v278_v52 }
 0x1b7   :  { %v291_v60 = vor.u32 1.1754944e-38, %v290_v35  ;;  %vm289_vm13 = vcmp.eq.f32.partialorder %v288_v47, 8.507059e+37 }
 0x1bb   :  { %v511_v26 = vpop.eup %510 }
 0x1bc   :  { %v280_v44 = vmul.f32 %v511_v26, %v278_v52  ;;  %vm285_vm10 = vweird.f32 %v511_v26 }
 0x1bd   :  { %vm286_vm12 = vmor %vm284_vm11, %vm285_vm10 }
 0x1be   :  { %v281_v59 = vsub.f32 1.0, %v280_v44 }
 0x1c0   :  { %v282_v7 = vmul.f32 %v511_v26, %v281_v59 }
 0x1c2   :  { %v283_v54 = vadd.f32 %v511_v26, %v282_v7 }
 0x1c4   :  { %v287_v48 = vsel %vm286_vm12, %v511_v26, %v283_v54 }
 0x1c5   :  { %v292_v49 = vsel %vm289_vm13, %v291_v60, %v287_v48 }
 0x1c6   :  { %v294_v51 = vperm.slane %v292_v49, 0  ;;  %v343_v50 = vperm.slane %v292_v49, 1 }
 0x1c8   :  { %311 = vperm.xlu0 %493, %v294_v51   ;;  %305 = vperm.xlu2 %492, %v294_v51  }
 0x1c9   :  { %299 = vperm.xlu1 %491, %v294_v51  }
 0x1d0   :  { %500 = vset.pattern.permute.xlu0 %v303_v34  ;;  %494 = vset.pattern.permute.xlu2 %v315_v62 }
 0x1d1   :  { %495 = vset.pattern.permute.xlu1 %v321_v56 }
 0x1d8   :  { %354 = vperm.xlu0 %500, %v343_v50   ;;  %317 = vperm.xlu2 %494, %v294_v51  }
 0x1d9   :  { %323 = vperm.xlu1 %495, %v294_v51  }
 0x1e0   :  { %505 = vset.pattern.permute.xlu0 %v333_v57  ;;  %496 = vset.pattern.permute.xlu2 %v327_v61 }
 0x1e1   :  { %497 = vset.pattern.permute.xlu1 %v333_v57 }
 0x1e8   :  { %384 = vperm.xlu0 %505, %v343_v50   ;;  %329 = vperm.xlu2 %496, %v294_v51  }
 0x1e9   :  { %335 = vperm.xlu1 %497, %v294_v51  }
 0x1f0   :  { %498 = vset.pattern.permute.xlu2 %v339_v16  ;;  %507 = vset.pattern.permute.xlu0 %v339_v16 }
 0x1f1   :  { %499 = vset.pattern.permute.xlu1 %v296_v25 }
 0x1f8   :  { %341 = vperm.xlu2 %498, %v294_v51  }
 0x1f9   :  { %348 = vperm.xlu1 %499, %v343_v50  }
 0x200   :  { %501 = vset.pattern.permute.xlu2 %v309_v33 }
 0x201   :  { %502 = vset.pattern.permute.xlu1 %v315_v62 }
 0x208   :  { %360 = vperm.xlu2 %501, %v343_v50  }
 0x209   :  { %366 = vperm.xlu1 %502, %v343_v50  }
 0x210   :  { %503 = vset.pattern.permute.xlu2 %v321_v56 }
 0x211   :  { %504 = vset.pattern.permute.xlu1 %v327_v61 }
 0x218   :  { %372 = vperm.xlu2 %503, %v343_v50  }
 0x219   :  { %378 = vperm.xlu1 %504, %v343_v50  }
 0x220   :  { %506 = vset.pattern.permute.xlu2 %v339_v16 }
 0x222   :  { %v306_v53 = vpop.permute.xlu2 %305 }
 0x223   :  { %v394_v17 = vmul.f32 %v306_v53, %v616_v11  ;;  %v395_v15 = vmul.f32 %v306_v53, %v618_v12 }
 0x225   :  { %426 = vst [vmem:[#allocation5 + $0x10] sm:$0xff] %v394_v17 }
 0x226   :  { %427 = vst [vmem:[#allocation5 + $0x18] sm:$0xff] %v395_v15 }
 0x228   :  { %390 = vperm.xlu2 %506, %v343_v50  }
 0x232   :  { %v318_v8 = vpop.permute.xlu2 %317 }
 0x233   :  { %v398_v55 = vmul.f32 %v318_v8, %v634_v20  ;;  %v399_v24 = vmul.f32 %v318_v8, %v636_v21 }
 0x235   :  { %430 = vst [vmem:[#allocation5 + $0x30] sm:$0xff] %v398_v55 }
 0x236   :  { %431 = vst [vmem:[#allocation5 + $0x38] sm:$0xff] %v399_v24 }
 0x23a   :  { %v312_v58 = vpop.permute.xlu0 %311 }
 0x23b   :  { %v396_v3 = vmul.f32 %v312_v58, %v604_v5  ;;  %v397_v25 = vmul.f32 %v312_v58, %v606_v6  ;;  %v300_v33 = vpop.permute.xlu1 %299 }
 0x23c   :  { %v392_v11 = vmul.f32 %v300_v33, %v598_v2  ;;  %v393_v12 = vmul.f32 %v300_v33, %v602_v4 }
 0x23d   :  { %428 = vst [vmem:[#allocation5 + $0x20] sm:$0xff] %v396_v3 }
 0x23e   :  { %429 = vst [vmem:[#allocation5 + $0x28] sm:$0xff] %v397_v25 }
 0x23f   :  { %424 = vst [vmem:[#allocation5] sm:$0xff] %v392_v11 }
 0x240   :  { %425 = vst [vmem:[#allocation5 + $0x8] sm:$0xff] %v393_v12 }
 0x242   :  { %v330_v34 = vpop.permute.xlu2 %329 }
 0x243   :  { %v402_v20 = vmul.f32 %v330_v34, %v648_v27  ;;  %v403_v21 = vmul.f32 %v330_v34, %v650_v28 }
 0x245   :  { %434 = vst [vmem:[#allocation5 + $0x50] sm:$0xff] %v402_v20 }
 0x246   :  { %435 = vst [vmem:[#allocation5 + $0x58] sm:$0xff] %v403_v21 }
 0x24a   :  { %v355_v42 = vpop.permute.xlu0 %354 }
 0x24b   :  { %v410_v5 = vmul.f32 %v355_v42, %v612_v9  ;;  %v411_v6 = vmul.f32 %v355_v42, %v614_v10  ;;  %v324_v63 = vpop.permute.xlu1 %323 }
 0x24c   :  { %v400_v2 = vmul.f32 %v324_v63, %v638_v22  ;;  %v401_v4 = vmul.f32 %v324_v63, %v640_v23 }
 0x24d   :  { %442 = vst [vmem:[#allocation5 + $0x90] sm:$0xff] %v410_v5 }
 0x24e   :  { %443 = vst [vmem:[#allocation5 + $0x98] sm:$0xff] %v411_v6 }
 0x24f   :  { %432 = vst [vmem:[#allocation5 + $0x40] sm:$0xff] %v400_v2 }
 0x250   :  { %433 = vst [vmem:[#allocation5 + $0x48] sm:$0xff] %v401_v4 }
 0x252   :  { %v342_v43 = vpop.permute.xlu2 %341 }
 0x253   :  { %v406_v27 = vmul.f32 %v342_v43, %v674_v40  ;;  %v407_v28 = vmul.f32 %v342_v43, %v676_v41 }
 0x255   :  { %438 = vst [vmem:[#allocation5 + $0x70] sm:$0xff] %v406_v27 }
 0x256   :  { %439 = vst [vmem:[#allocation5 + $0x78] sm:$0xff] %v407_v28 }
 0x25a   :  { %v385_v52 = vpop.permute.xlu0 %384 }
 0x25b   :  { %v420_v9 = vmul.f32 %v385_v52, %v666_v36  ;;  %v421_v10 = vmul.f32 %v385_v52, %v668_v37  ;;  %v336_v26 = vpop.permute.xlu1 %335 }
 0x25c   :  { %v404_v22 = vmul.f32 %v336_v26, %v670_v38  ;;  %v405_v23 = vmul.f32 %v336_v26, %v672_v39 }
 0x25d   :  { %452 = vst [vmem:[#allocation5 + $0xe0] sm:$0xff] %v420_v9 }
 0x25e   :  { %453 = vst [vmem:[#allocation5 + $0xe8] sm:$0xff] %v421_v10 }
 0x25f   :  { %436 = vst [vmem:[#allocation5 + $0x60] sm:$0xff] %v404_v22 }
 0x260   :  { %437 = vst [vmem:[#allocation5 + $0x68] sm:$0xff] %v405_v23 }
 0x262   :  { %v361_v44 = vpop.permute.xlu2 %360 }
 0x263   :  { %v412_v40 = vmul.f32 %v361_v44, %v620_v13  ;;  %v413_v41 = vmul.f32 %v361_v44, %v622_v14 }
 0x265   :  { %444 = vst [vmem:[#allocation5 + $0xa0] sm:$0xff] %v412_v40 }
 0x266   :  { %445 = vst [vmem:[#allocation5 + $0xa8] sm:$0xff] %v413_v41 }
 0x26b   :  { %v349_v59 = vpop.permute.xlu1 %348 }
 0x26c   :  { %v408_v36 = vmul.f32 %v349_v59, %v594_v0  ;;  %v409_v37 = vmul.f32 %v349_v59, %v596_v1 }
 0x26e   :  { %440 = vst [vmem:[#allocation5 + $0x80] sm:$0xff] %v408_v36 }
 0x26f   :  { %441 = vst [vmem:[#allocation5 + $0x88] sm:$0xff] %v409_v37 }
 0x272   :  { %v373_v38 = vpop.permute.xlu2 %372 }
 0x273   :  { %v416_v39 = vmul.f32 %v373_v38, %v652_v29  ;;  %v417_v35 = vmul.f32 %v373_v38, %v654_v30 }
 0x275   :  { %448 = vst [vmem:[#allocation5 + $0xc0] sm:$0xff] %v416_v39 }
 0x276   :  { %449 = vst [vmem:[#allocation5 + $0xc8] sm:$0xff] %v417_v35 }
 0x27b   :  { %v367_v7 = vpop.permute.xlu1 %366 }
 0x27c   :  { %v414_v13 = vmul.f32 %v367_v7, %v630_v18  ;;  %v415_v14 = vmul.f32 %v367_v7, %v632_v19 }
 0x27e   :  { %446 = vst [vmem:[#allocation5 + $0xb0] sm:$0xff] %v414_v13 }
 0x27f   :  { %447 = vst [vmem:[#allocation5 + $0xb8] sm:$0xff] %v415_v14 }
 0x282   :  { %v391_v47 = vpop.permute.xlu2 %390 }
 0x283   :  { %v422_v0 = vmul.f32 %v391_v47, %v684_v45  ;;  %v423_v1 = vmul.f32 %v391_v47, %v686_v46 }
 0x285   :  { %454 = vst [vmem:[#allocation5 + $0xf0] sm:$0xff] %v422_v0 }
 0x286   :  { %455 = vst [vmem:[#allocation5 + $0xf8] sm:$0xff] %v423_v1 }
 0x28b   :  { %v379_v29 = vpop.permute.xlu1 %378 }
 0x28c   :  { %v418_v18 = vmul.f32 %v379_v29, %v656_v31  ;;  %v419_v19 = vmul.f32 %v379_v29, %v658_v32 }
 0x28e   :  { %450 = vst [vmem:[#allocation5 + $0xd0] sm:$0xff] %v418_v18 }
 0x28f   :  { %451 = vst [vmem:[#allocation5 + $0xd8] sm:$0xff] %v419_v19 }
 0x290   :  { %468 = dma.vmem_to_hbm [thread:$0]  %s461_s8, 4096, %s463_s11, [#allocation4], %s565_s17, %s565_s17, %s566_s18  }
 0x291   :  { %562 = dma.done.wait [#allocation4], 4096  }
 0x292   :  { %563 = vsyncadd [#allocation4], 4294963200 }
 0x293   :  { %473 = vsyncpa [#allocation3], 1 }
 0x294   :  { %474 = vsyncpa [#allocation4], 1 }

</bundles_post_ra>
